<compile_context>
chip_gen: v7x
topology: tpu7x:2x2x1
jax: 0.10.0
libtpu: 0.0.40
codegen_flags: <defaults>
</compile_context>

<pallas_src>
import functools

import jax
import jax.numpy as jnp
from jax import lax
from jax.experimental import pallas as pl
from jax.experimental.pallas import tpu as pltpu

_LANE = 128


def _round_up(x: int, m: int) -> int:
    return ((x + m - 1) // m) * m


def _sublane(dtype) -> int:
    # Sublane packing: 8 rows for 32-bit, 16 for 16-bit, 32 for 8-bit dtypes.
    return max(8, 32 // jnp.dtype(dtype).itemsize)


def _tpu_hw():
    """Returns (vmem_capacity_bytes, tensorcores_per_chip)."""
    kind = ""
    try:
        kind = jax.devices()[0].device_kind.lower()
    except Exception:
        pass
    is_v7 = "7" in kind
    num_cores = 2 if is_v7 else 1
    vmem = (64 << 20) if is_v7 else (128 << 20)   # kind-based fallback
    try:
        vmem = int(pltpu.get_tpu_info().vmem_capacity_bytes)
    except Exception:
        pass
    return vmem, num_cores


def _rmsnorm_kernel(x_ref, w_ref, o_ref, *, eps: float, inv_hidden: float,
                    chunk: int, unroll: bool):
    # x_ref: (tile, hidden), w_ref: (1, hidden), o_ref: (tile, hidden).
    # hidden may not be a multiple of 128: Mosaic masks the padded lanes in the
    # axis=-1 reduction, so no explicit lane mask or lane padding is needed.
    # For the ragged final grid block, OOB rows hold unspecified data; their
    # outputs are dropped at write-back (rows are independent -> safe).
    w = w_ref[...]
    in_dtype = x_ref.dtype
    n_chunks = x_ref.shape[0] // chunk

    def body(c, carry):
        r = pl.multiple_of(c * chunk, chunk)
        x = x_ref[pl.ds(r, chunk), :].astype(jnp.float32)        # x.float()
        ssq = jnp.sum(x * x, axis=-1, keepdims=True)
        var = ssq * inv_hidden                                    # mean(x^2, -1)
        x_norm = x * lax.rsqrt(var + eps)                         # x * rsqrt(var+eps)
        # weight * x.to(input_dtype): cast back before the multiply, output dtype
        # is promote(weight, x) exactly as in PyTorch.
        o_ref[pl.ds(r, chunk), :] = (w * x_norm.astype(in_dtype)).astype(o_ref.dtype)
        return carry

    lax.fori_loop(0, n_chunks, body, 0, unroll=unroll)


def rmsnorm(x: jax.Array, weight: jax.Array, eps: float, *,
            row_tile: int | None = None) -> jax.Array:
    """Pallas implementation of the PyTorch LayerNorm (RMSNorm) forward."""
    orig_shape = x.shape
    hidden = orig_shape[-1]
    assert weight.shape == (hidden,)

    out_dtype = jnp.promote_types(weight.dtype, x.dtype)
    x2d = x.reshape(-1, hidden)
    rows = x2d.shape[0]
    w2d = weight.reshape(1, hidden)

    in_bytes = jnp.dtype(x.dtype).itemsize
    out_bytes = jnp.dtype(out_dtype).itemsize
    w_bytes = jnp.dtype(weight.dtype).itemsize
    sublane = max(_sublane(x.dtype), _sublane(out_dtype))
    hidden_lanes = _round_up(hidden, _LANE)       # VMEM/vreg footprint per row

    vmem_bytes, num_cores = _tpu_hw()

    # Inner compute chunk: keep one chunk's f32 working set near the vreg file
    # (<= ~64 KiB per live f32 array) instead of spilling a full-block f32 copy.
    chunk = sublane
    while chunk * 2 * hidden_lanes * 4 <= (64 << 10) and chunk * 2 <= 512:
        chunk *= 2
    chunk = min(chunk, max(sublane, _round_up(rows, sublane)))

    # Row tile (DMA block) sized by bytes: aim for >= ~4 MiB input blocks,
    # capped by ~50% of VMEM for the double-buffered input + output blocks.
    per_row_io = 2 * hidden_lanes * (in_bytes + out_bytes)
    if row_tile is None:
        cap = max(1024, (4 << 20) // max(1, hidden_lanes * in_bytes))
        budget = int(vmem_bytes * 0.5)
        tile = min(cap, max(chunk, budget // per_row_io))
    else:
        tile = row_tile
    tile = max(chunk, (tile // chunk) * chunk)
    tile = min(tile, _round_up(rows, chunk))

    # Keep enough grid steps: >=2 for double-buffer overlap, >=4 on v7x so the
    # "parallel" axis splits evenly across its 2 TensorCores.  Skip for tiny
    # problems where per-step overhead dominates anyway.
    min_steps = 2 * num_cores
    if rows * hidden_lanes * in_bytes >= (2 << 20):
        while tile > chunk and pl.cdiv(rows, tile) < min_steps:
            tile = max(chunk, ((tile // 2) // chunk) * chunk)

    grid = (pl.cdiv(rows, tile),)
    n_chunks = tile // chunk

    # Scoped-VMEM limit sized to the pipelined footprint (I/O buffers + resident
    # weight + one chunk of f32 temporaries) plus headroom, clamped to physical.
    footprint = (tile * per_row_io
                 + 2 * hidden_lanes * w_bytes
                 + 4 * chunk * hidden_lanes * 4)
    vmem_limit = int(min(vmem_bytes, max(16 << 20, footprint + (4 << 20))))

    out = pl.pallas_call(
        functools.partial(_rmsnorm_kernel, eps=float(eps),
                          inv_hidden=1.0 / float(hidden),
                          chunk=chunk, unroll=(n_chunks <= 8)),
        out_shape=jax.ShapeDtypeStruct((rows, hidden), out_dtype),
        grid_spec=pltpu.PrefetchScalarGridSpec(
            num_scalar_prefetch=0,
            grid=grid,
            in_specs=[
                pl.BlockSpec((tile, hidden), lambda i: (i, 0)),
                pl.BlockSpec((1, hidden), lambda i: (0, 0)),   # resident weight
            ],
            out_specs=pl.BlockSpec((tile, hidden), lambda i: (i, 0)),
        ),
        compiler_params=pltpu.CompilerParams(
            dimension_semantics=("parallel",),
            vmem_limit_bytes=vmem_limit,
        ),
    )(x2d, w2d)

    return out.reshape(orig_shape[:-1] + (hidden,))


def rmsnorm_reference(x, weight, eps):
    input_dtype = x.dtype
    xf = x.astype(jnp.float32)
    var = jnp.mean(xf * xf, axis=-1, keepdims=True)
    xn = xf * lax.rsqrt(var + eps)
    return weight * xn.astype(input_dtype)


if __name__ == "__main__":
    key = jax.random.PRNGKey(0)
    eps = 1e-6

    # Small shape consistent with the module: (batch, seq, hidden) = (2, 8, 32).
    batch, seq, hidden = 2, 8, 32
    x = jax.random.normal(key, (batch, seq, hidden), dtype=jnp.float32)
    weight = jnp.ones((hidden,), dtype=jnp.float32)  # nn.Parameter(torch.ones(hidden))

    out = jax.block_until_ready(rmsnorm(x, weight, eps))
    ref = rmsnorm_reference(x, weight, eps)
    assert out.shape == ref.shape and out.dtype == ref.dtype
    assert jnp.allclose(out, ref, atol=1e-5, rtol=1e-5)

    # Ragged-rows + mixed dtypes path (bf16 x, f32 weight -> f32 out, matching
    # PyTorch promotion); hidden a multiple of 128, rows not a tile multiple.
    k2 = jax.random.PRNGKey(0)
    x2 = jax.random.normal(k2, (3, 5, 256), dtype=jnp.bfloat16)
    w2 = (1.0 + 0.01 * jax.random.normal(k2, (256,), dtype=jnp.float32))
    out2 = jax.block_until_ready(rmsnorm(x2, w2, eps))
    ref2 = rmsnorm_reference(x2, w2, eps)
    assert out2.shape == ref2.shape and out2.dtype == ref2.dtype
    assert jnp.allclose(out2, ref2, atol=1e-2, rtol=1e-2)

    print("KERNEL_OK")
</pallas_src>

<mosaic_0001>
module attributes {stable_mosaic.version = 11 : i64} {
  func.func @_rmsnorm_kernel(%arg0: i32, %arg1: memref<16x32xf32, #tpu.memory_space<vmem>>, %arg2: memref<1x32xf32, #tpu.memory_space<vmem>>, %arg3: memref<16x32xf32, #tpu.memory_space<vmem>>) attributes {dimension_semantics = [#tpu.dimension_semantics<parallel>], iteration_bounds = array<i64: 1>, scalar_prefetch = 0 : i64, scratch_operands = 0 : i64, tpu.core_type = #tpu.core_type<tc>, window_params = [{transform_indices = @transform_0, window_bounds = array<i64: 16, 32>}, {pipeline_mode = #tpu.pipeline_mode<synchronous>, transform_indices = @transform_1, window_bounds = array<i64: 1, 32>}, {transform_indices = @transform_2, window_bounds = array<i64: 16, 32>}]} {
    %c0 = arith.constant 0 : index
    %c0_0 = arith.constant 0 : index
    %0 = vector.load %arg2[%c0, %c0_0] : memref<1x32xf32, #tpu.memory_space<vmem>>, vector<1x32xf32>
    %c0_i32 = arith.constant 0 : i32
    %c16_i32 = arith.constant 16 : i32
    %1 = arith.muli %c0_i32, %c16_i32 : i32
    %2 = tpu.assume_multiple %1, 16 : i32
    %3 = arith.index_cast %2 : i32 to index
    %c0_1 = arith.constant 0 : index
    %4 = vector.load %arg1[%3, %c0_1] : memref<16x32xf32, #tpu.memory_space<vmem>>, vector<16x32xf32>
    %5 = arith.mulf %4, %4 : vector<16x32xf32>
    %cst = arith.constant dense<0.000000e+00> : vector<16xf32>
    %6 = vector.multi_reduction <add>, %5, %cst [1] : vector<16x32xf32> to vector<16xf32>
    %7 = vector.shape_cast %6 : vector<16xf32> to vector<16x1xf32>
    %cst_2 = arith.constant 3.125000e-02 : f32
    %8 = vector.broadcast %cst_2 : f32 to vector<16x1xf32>
    %9 = arith.mulf %7, %8 : vector<16x1xf32>
    %cst_3 = arith.constant 9.99999997E-7 : f32
    %10 = vector.broadcast %cst_3 : f32 to vector<16x1xf32>
    %11 = arith.addf %9, %10 : vector<16x1xf32>
    %12 = math.rsqrt %11 : vector<16x1xf32>
    %13 = vector.broadcast %12 : vector<16x1xf32> to vector<16x32xf32>
    %14 = arith.mulf %4, %13 : vector<16x32xf32>
    %15 = vector.broadcast %0 : vector<1x32xf32> to vector<16x32xf32>
    %16 = arith.mulf %15, %14 : vector<16x32xf32>
    %17 = arith.index_cast %2 : i32 to index
    %c0_4 = arith.constant 0 : index
    %18 = vector.load %arg3[%17, %c0_4] : memref<16x32xf32, #tpu.memory_space<vmem>>, vector<16x32xf32>
    tpu.vector_store %arg3[%17, %c0_4], %16 {strides = array<i32>} : memref<16x32xf32, #tpu.memory_space<vmem>>, vector<16x32xf32>,
    %c1_i32 = arith.constant 1 : i32
    return
  }
  func.func @transform_0(%arg0: i32) -> (i32, i32) {
    %c0_i32 = arith.constant 0 : i32
    %c0_i32_0 = arith.constant 0 : i32
    return %arg0, %c0_i32 : i32, i32
  }
  func.func @transform_1(%arg0: i32) -> (i32, i32) {
    %c0_i32 = arith.constant 0 : i32
    %c0_i32_0 = arith.constant 0 : i32
    %c0_i32_1 = arith.constant 0 : i32
    return %c0_i32, %c0_i32_0 : i32, i32
  }
  func.func @transform_2(%arg0: i32) -> (i32, i32) {
    %c0_i32 = arith.constant 0 : i32
    %c0_i32_0 = arith.constant 0 : i32
    return %arg0, %c0_i32 : i32, i32
  }
}

</mosaic_0001>

<bundles_post_ra>
// kernel: tpu_custom_call.1
= control target key start
LH: loop header
LB: loop body
LE: loop exit
PB: predicated region body
PF: predicated region fallthrough
CT: control target
= control target key end

     0   :  { %7 = vsyncpa [#allocation3], 0  ;;  %s186_s0 = inlined_call_operand.hbm [shape: f32[16,32], index: 0, kind: input, shape index: {}]   ;;  %s187_s1 = inlined_call_operand.vmem [shape: f32[1,32], index: 1, kind: input, shape index: {}]   ;;  %s188_s2 = inlined_call_operand.hbm [shape: f32[16,32], index: 2, kind: output, shape index: {}]  }
   0x1   :  { %8 = vsyncpa [#allocation4], 0  ;;  %s130_s9 = smov [#allocation2]   ;;  %s82_s13 = scalar_lea.hbm %s186_s0, 256 }
   0x2   :  { %s14_s10 = sshll.u32 %s130_s9, 4  ;;  %p83_p0 = scmp.ne.s32.totalorder %s186_s0, %s82_s13  ;;  %s15_s10 = int_to_ptr.vmem [resolvable:$true] %s14_s10 }
   0x3   :  { %p86_p1 = scmp.lt.u32.totalorder %s82_s13, %s186_s0 }
   0x5   :  { %p88_p2 = pnand %p86_p1, %p83_p0 }
   0x7   :  { %91 = shalt.err (!%p88_p2)
}
   0x8   :  { %s92_s18 = scalar_lea.vmem %s15_s10, 256  ;;  %p97_p4 = scmp.lt.s32.totalorder %s15_s10, %s15_s10 }
   0x9   :  { %p93_p3 = scmp.ne.s32.totalorder %s15_s10, %s92_s18  ;;  %p98_p5 = scmp.lt.s32.totalorder %s92_s18, %s92_s18 }
   0xb   :  { %p99_p6 = por %p98_p5, %p97_p4 }
   0xd   :  { %p100_p7 = pnand %p99_p6, %p93_p3 }
   0xf   :  { %103 = shalt.err (!%p100_p7)
}
  0x10   :  { %s131_s19 = smov 128   ;;  %s132_s20 = smov 8  }
  0x11   :  { %20 = dma.hbm_to_vmem [thread:$0]  %s186_s0, 256, %s15_s10, [#allocation3], %s131_s19, %s131_s19, %s132_s20  }
  0x12   :  { %126 = dma.done.wait [#allocation3], 256  }
  0x13   :  { %127 = vsyncadd [#allocation3], 4294967040  ;;  %v27_v0 = vld [vmem:[#allocation2] sm:$0xff]  ;;  %vm31_vm0 = vcmask 261120   ;;  %v28_v1 = vld [vmem:[#allocation2 + $0x8] sm:$0xff]  ;;  %s133_s24 = smov [#allocation5]  }
  0x14   :  { %v29_v2 = vmul.f32 %v27_v0, %v27_v0  ;;  %v30_v3 = vmul.f32 %v28_v1, %v28_v1  ;;  %v73_v13 = vld [vmem:[%s187_s1] ss:$0 sm:$0xff]  ;;  %s61_s25 = sshll.u32 %s133_s24, 4  ;;  %s62_s25 = int_to_ptr.vmem [resolvable:$true] %s61_s25 }
  0x15   :  { %s104_s26 = scalar_lea.vmem %s62_s25, 256  ;;  %p109_p9 = scmp.lt.s32.totalorder %s62_s25, %s62_s25 }
  0x16   :  { %v32_v4 = vsel %vm31_vm0, %v29_v2, 0.0  ;;  %v35_v5 = vsel %vm31_vm0, %v30_v3, 0.0  ;;  %p105_p8 = scmp.ne.s32.totalorder %s62_s25, %s104_s26  ;;  %p110_p10 = scmp.lt.s32.totalorder %s104_s26, %s104_s26 }
  0x17   :  { %33 = vadd.xlane.f32.xlu0 %v32_v4 }
  0x18   :  { %p111_p11 = por %p110_p10, %p109_p9 }
  0x1a   :  { %p112_p12 = pnand %p111_p11, %p105_p8 }
  0x1b   :  { %36 = vadd.xlane.f32.xlu0 %v35_v5 }
  0xa4   :  { %v34_v6 = vpop.xlane.xlu0 %33 }
  0xa5   :  { %v38_v7 = vmul.f32 0.03125, %v34_v6 }
  0xa7   :  { %v40_v8 = vadd.f32 1e-06, %v38_v7 }
  0xa8   :  { %v37_v9 = vpop.xlane.xlu0 %36 }
  0xa9   :  { %78 = vrsqrt.f32 %v40_v8  ;;  %v39_v10 = vmul.f32 0.03125, %v37_v9 }
  0xab   :  { %v41_v11 = vadd.f32 1e-06, %v39_v10 }
  0xad   :  { %80 = vrsqrt.f32 %v41_v11 }
  0xb3   :  { %v79_v12 = vpop.eup %78 }
  0xb4   :  { %v44_v14 = vmul.f32 %v79_v12, %v27_v0 }
  0xb6   :  { %v52_v15 = vmul.f32 %v73_v13, %v44_v14 }
  0xb7   :  { %v81_v16 = vpop.eup %80 }
  0xb8   :  { %v45_v17 = vmul.f32 %v81_v16, %v28_v1  ;;  %54 = vst.msk [vmem:[#allocation5] sm:$0xff] %vm31_vm0, %v52_v15 }
  0xba   :  { %v53_v18 = vmul.f32 %v73_v13, %v45_v17 }
  0xbc   :  { %55 = vst.msk [vmem:[#allocation5 + $0x8] sm:$0xff] %vm31_vm0, %v53_v18 }
  0xbd   :  { %115 = shalt.err (!%p112_p12)
}
  0xbe   :  { %s116_s28 = scalar_lea.hbm %s188_s2, 256 }
  0xbf   :  { %p117_p13 = scmp.ne.s32.totalorder %s188_s2, %s116_s28  ;;  %p120_p0 = scmp.lt.u32.totalorder %s116_s28, %s188_s2 }
  0xc1   :  { %p122_p1 = pnand %p120_p0, %p117_p13 }
  0xc3   :  { %125 = shalt.err (!%p122_p1)
}
  0xc4   :  { %67 = dma.vmem_to_hbm [thread:$0]  %s62_s25, 256, %s188_s2, [#allocation4], %s131_s19, %s131_s19, %s132_s20  }
  0xc5   :  { %128 = dma.done.wait [#allocation4], 256  }
  0xc6   :  { %129 = vsyncadd [#allocation4], 4294967040 }
  0xc7   :  { %71 = vsyncpa [#allocation3], 1 }
  0xc8   :  { %72 = vsyncpa [#allocation4], 1 }

</bundles_post_ra>
